<compile_context>
chip_gen: v6e
topology: v6e:2x2x1
jax: 0.10.0
libtpu: 0.0.40
codegen_flags: <defaults>
</compile_context>

<pallas_src>
import functools

import jax
import jax.numpy as jnp
from jax.experimental import pallas as pl
from jax.experimental.pallas import tpu as pltpu


_LANE = 128
# Conservative tile budget: fits v5e's 16 MiB default scoped VMEM; far under
# v6e (32 MiB default / 128 MiB) and v7x (32 MiB default / 64 MiB).
_VMEM_BUDGET_BYTES = 12 * 1024 * 1024


def _round_up(x: int, m: int) -> int:
    return ((x + m - 1) // m) * m


def _sublane(dtype) -> int:
    # Packed-sublane multiple per element width (f32->8, bf16->16, int8/fp8->32).
    return {4: 8, 2: 16, 1: 32}.get(jnp.dtype(dtype).itemsize, 8)


def _divisor_tile(padded: int, target: int, unit: int) -> int:
    """Largest multiple of `unit` that divides `padded` and is <= target."""
    target = max(unit, min(target, padded))
    t = (target // unit) * unit
    while padded % t:
        t -= unit
    return t


# -----------------------------------------------------------------------------
# Kernels
# -----------------------------------------------------------------------------
def _linear_sigmoid_kernel_single_k(x_ref, w_ref, b_ref, o_ref):
    # Whole (padded) K in one tile: no accumulator scratch, no RMW traffic.
    acc = jnp.dot(x_ref[...], w_ref[...], preferred_element_type=jnp.float32)
    o_ref[...] = jax.nn.sigmoid(acc + b_ref[...]).astype(o_ref.dtype)


def _linear_sigmoid_kernel_multi_k(x_ref, w_ref, b_ref, o_ref, acc_ref):
    k = pl.program_id(2)
    part = jnp.dot(x_ref[...], w_ref[...], preferred_element_type=jnp.float32)

    @pl.when(k == 0)
    def _store_first():          # store the first partial (no zero-init + +=)
        acc_ref[...] = part

    @pl.when(k > 0)
    def _accumulate():
        acc_ref[...] += part

    @pl.when(k == pl.num_programs(2) - 1)
    def _finalize():
        y = acc_ref[...] + b_ref[...]          # (tm, tn) + (1, tn), f32
        o_ref[...] = jax.nn.sigmoid(y).astype(o_ref.dtype)


# -----------------------------------------------------------------------------
# Wrappers
# -----------------------------------------------------------------------------
def prepare_params(weight_t, bias, *, compute_dtype=jnp.bfloat16):
    """Pad + cast Linear parameters ONCE (hoisted out of the per-call path).

    weight_t: (in_features, out_features)  -- transpose of torch Linear .weight
    bias:     (out_features,) or (1, out_features)
    Returns (weight_padded (pk, pn) in compute_dtype, bias_padded (1, pn) f32).
    """
    in_f, out_f = weight_t.shape
    pk = _round_up(in_f, _LANE)
    pn = _round_up(out_f, _LANE)
    wp = jnp.pad(weight_t, ((0, pk - in_f), (0, pn - out_f))).astype(compute_dtype)
    bp = jnp.pad(jnp.reshape(bias, (1, -1)).astype(jnp.float32),
                 ((0, 0), (0, pn - out_f)))
    return wp, bp


@functools.partial(
    jax.jit, static_argnames=("out_features", "tm", "tn", "tk", "out_dtype"))
def sigmod_linear_padded(x, w_padded, b_padded, *, out_features,
                         tm=512, tn=512, tk=1024, out_dtype=None):
    """y = sigmoid(x @ weight_t + bias), with pre-padded / pre-cast parameters.

    x:        (..., in_features)
    w_padded: (pk, pn)  (from prepare_params; pk, pn multiples of 128)
    b_padded: (1, pn)   float32
    Returns:  (..., out_features) in out_dtype (default: x.dtype)
    """
    *lead, in_f = x.shape
    pk, pn = w_padded.shape
    assert in_f <= pk and b_padded.shape == (1, pn) and out_features <= pn

    compute_dtype = w_padded.dtype
    if out_dtype is None:
        out_dtype = x.dtype
    in_itemsize = jnp.dtype(compute_dtype).itemsize
    out_itemsize = jnp.dtype(out_dtype).itemsize
    sublane = _sublane(compute_dtype)

    x2 = x.reshape(-1, in_f)
    m = x2.shape[0]
    pm = _round_up(max(m, 1), sublane)

    # ---- tile selection (static shapes only) --------------------------------
    tn_sel = _divisor_tile(pn, tn, _LANE)            # exact divisor: no N over-pad
    if pm <= tm:
        tm_sel = pm                                   # small batch: single M tile
    else:
        tm_sel = _divisor_tile(pm, tm, sublane)
        if tm_sel < max(sublane, tm // 2):            # divisor too small -> pad M
            tm_sel = _round_up(tm, sublane)
            pm = _round_up(pm, tm_sel)

    def _footprint(tk_val, nk):
        return (2 * tm_sel * tk_val * in_itemsize          # x tiles (double-buffered)
                + 2 * tk_val * tn_sel * in_itemsize        # w tiles (double-buffered)
                + 2 * tm_sel * tn_sel * out_itemsize       # out tiles
                + 2 * tn_sel * 4                           # bias tile
                + (tm_sel * tn_sel * 4 if nk > 1 else 0))  # f32 accumulator

    if pk <= tk and _footprint(pk, 1) <= _VMEM_BUDGET_BYTES:
        tk_sel = pk                                   # collapse K: no accumulator
    else:
        tk_sel = _divisor_tile(pk, min(tk, pk), _LANE)
        while tk_sel > _LANE and _footprint(tk_sel, 2) > _VMEM_BUDGET_BYTES:
            tk_sel = _divisor_tile(pk, tk_sel - _LANE, _LANE)
    nk = pk // tk_sel

    # ---- pad / cast activations only when needed ----------------------------
    xp = x2.astype(compute_dtype)
    if pm != m or pk != in_f:
        xp = jnp.pad(xp, ((0, pm - m), (0, pk - in_f)))

    if nk == 1:
        out_padded = pl.pallas_call(
            _linear_sigmoid_kernel_single_k,
            out_shape=jax.ShapeDtypeStruct((pm, pn), out_dtype),
            grid_spec=pltpu.PrefetchScalarGridSpec(
                num_scalar_prefetch=0,
                grid=(pm // tm_sel, pn // tn_sel),
                in_specs=[
                    pl.BlockSpec((tm_sel, pk), lambda i, j: (i, 0)),   # x
                    pl.BlockSpec((pk, tn_sel), lambda i, j: (0, j)),   # weight
                    pl.BlockSpec((1, tn_sel), lambda i, j: (0, j)),    # bias
                ],
                out_specs=pl.BlockSpec((tm_sel, tn_sel), lambda i, j: (i, j)),
            ),
            compiler_params=pltpu.CompilerParams(
                dimension_semantics=("parallel", "parallel"),
            ),
        )(xp, w_padded, b_padded)
    else:
        out_padded = pl.pallas_call(
            _linear_sigmoid_kernel_multi_k,
            out_shape=jax.ShapeDtypeStruct((pm, pn), out_dtype),
            grid_spec=pltpu.PrefetchScalarGridSpec(
                num_scalar_prefetch=0,
                grid=(pm // tm_sel, pn // tn_sel, nk),
                in_specs=[
                    pl.BlockSpec((tm_sel, tk_sel), lambda i, j, k: (i, k)),  # x
                    pl.BlockSpec((tk_sel, tn_sel), lambda i, j, k: (k, j)),  # weight
                    # bias: independent of k -> one DMA per (i, j) output tile
                    pl.BlockSpec((1, tn_sel), lambda i, j, k: (0, j)),
                ],
                out_specs=pl.BlockSpec((tm_sel, tn_sel), lambda i, j, k: (i, j)),
                scratch_shapes=[pltpu.VMEM((tm_sel, tn_sel), jnp.float32)],
            ),
            compiler_params=pltpu.CompilerParams(
                dimension_semantics=("parallel", "parallel", "arbitrary"),
            ),
        )(xp, w_padded, b_padded)

    out = out_padded[:m, :out_features]
    return out.reshape(*lead, out_features)


def sigmod_linear(x, weight_t, bias, **kwargs):
    """One-shot convenience wrapper (re-pads/casts the parameters every call).
    Prefer prepare_params(...) + sigmod_linear_padded(...) for repeated use."""
    w_padded, b_padded = prepare_params(weight_t, bias)
    return sigmod_linear_padded(x, w_padded, b_padded,
                                out_features=weight_t.shape[1], **kwargs)


if __name__ == "__main__":
    key = jax.random.PRNGKey(0)

    # Shapes implied by the module forward: (batch, in_features) input.
    batch, in_features, out_features = 8, 32, 16

    kx, kw, kb, kx2, kw2, kb2 = jax.random.split(key, 6)
    x = jax.random.normal(kx, (batch, in_features), dtype=jnp.float32)
    # torch.nn.Linear-style uniform(-1/sqrt(in), 1/sqrt(in)) init.
    bound = 1.0 / (in_features ** 0.5)
    weight_t = jax.random.uniform(kw, (in_features, out_features),
                                  dtype=jnp.float32, minval=-bound, maxval=bound)
    bias = jax.random.uniform(kb, (1, out_features),
                              dtype=jnp.float32, minval=-bound, maxval=bound)

    # Hoisted parameter preparation: pad + bf16 cast happen once, not per call.
    w_padded, b_padded = prepare_params(weight_t, bias)
    out = sigmod_linear_padded(x, w_padded, b_padded, out_features=out_features)
    out = jax.block_until_ready(out)

    ref = jax.nn.sigmoid(x @ weight_t + bias)
    assert out.shape == (batch, out_features)
    # bf16 MXU operands with f32 accumulation -> loosened tolerance vs f32 ref.
    assert jnp.allclose(out, ref, atol=2e-2, rtol=2e-2), \
        float(jnp.max(jnp.abs(out - ref)))

    # Also exercise the multi-K (accumulator) path with a tiny K-tiled problem.
    in2 = 256
    bound2 = 1.0 / (in2 ** 0.5)
    x2 = jax.random.normal(kx2, (batch, in2), dtype=jnp.float32)
    w2 = jax.random.uniform(kw2, (in2, out_features),
                            dtype=jnp.float32, minval=-bound2, maxval=bound2)
    b2 = jax.random.uniform(kb2, (1, out_features),
                            dtype=jnp.float32, minval=-bound2, maxval=bound2)
    out2 = sigmod_linear(x2, w2, b2, tk=128)           # forces K grid of 2 steps
    out2 = jax.block_until_ready(out2)
    ref2 = jax.nn.sigmoid(x2 @ w2 + b2)
    assert out2.shape == (batch, out_features)
    assert jnp.allclose(out2, ref2, atol=2e-2, rtol=2e-2), \
        float(jnp.max(jnp.abs(out2 - ref2)))

    print("KERNEL_OK")
</pallas_src>

<mosaic_0001>
module attributes {stable_mosaic.version = 11 : i64} {
  func.func @_linear_sigmoid_kernel_single_k(%arg0: i32, %arg1: i32, %arg2: memref<16x128xbf16, #tpu.memory_space<vmem>>, %arg3: memref<128x128xbf16, #tpu.memory_space<vmem>>, %arg4: memref<1x128xf32, #tpu.memory_space<vmem>>, %arg5: memref<16x128xf32, #tpu.memory_space<vmem>>) attributes {dimension_semantics = [#tpu.dimension_semantics<parallel>, #tpu.dimension_semantics<parallel>], iteration_bounds = array<i64: 1, 1>, scalar_prefetch = 0 : i64, scratch_operands = 0 : i64, tpu.core_type = #tpu.core_type<tc>, window_params = [{transform_indices = @transform_0, window_bounds = array<i64: 16, 128>}, {transform_indices = @transform_1, window_bounds = array<i64: 128, 128>}, {transform_indices = @transform_2, window_bounds = array<i64: 1, 128>}, {transform_indices = @transform_3, window_bounds = array<i64: 16, 128>}]} {
    %c0 = arith.constant 0 : index
    %c0_0 = arith.constant 0 : index
    %0 = vector.load %arg2[%c0, %c0_0] : memref<16x128xbf16, #tpu.memory_space<vmem>>, vector<16x128xbf16>
    %c0_1 = arith.constant 0 : index
    %c0_2 = arith.constant 0 : index
    %1 = vector.load %arg3[%c0_1, %c0_2] : memref<128x128xbf16, #tpu.memory_space<vmem>>, vector<128x128xbf16>
    %cst = arith.constant dense<0.000000e+00> : vector<16x128xf32>
    %2 = tpu.matmul %0, %1, %cst {dimension_numbers = #tpu.dot_dimension_numbers<[1], [0], [0], [1], [0, 0, 1, 1], [], []>} : vector<16x128xbf16>, vector<128x128xbf16>, vector<16x128xf32> -> vector<16x128xf32>
    %c0_3 = arith.constant 0 : index
    %c0_4 = arith.constant 0 : index
    %3 = vector.load %arg4[%c0_3, %c0_4] : memref<1x128xf32, #tpu.memory_space<vmem>>, vector<1x128xf32>
    %4 = vector.broadcast %3 : vector<1x128xf32> to vector<16x128xf32>
    %5 = arith.addf %2, %4 : vector<16x128xf32>
    %6 = arith.negf %5 : vector<16x128xf32>
    %7 = math.exp %6 : vector<16x128xf32>
    %cst_5 = arith.constant 1.000000e+00 : f32
    %8 = vector.broadcast %cst_5 : f32 to vector<16x128xf32>
    %9 = arith.addf %8, %7 : vector<16x128xf32>
    %10 = arith.divf %8, %9 : vector<16x128xf32>
    %c0_6 = arith.constant 0 : index
    %c0_7 = arith.constant 0 : index
    %11 = vector.load %arg5[%c0_6, %c0_7] : memref<16x128xf32, #tpu.memory_space<vmem>>, vector<16x128xf32>
    tpu.vector_store %arg5[%c0_6, %c0_7], %10 {strides = array<i32>} : memref<16x128xf32, #tpu.memory_space<vmem>>, vector<16x128xf32>,
    return
  }
  func.func @transform_0(%arg0: i32, %arg1: i32) -> (i32, i32) {
    %c0_i32 = arith.constant 0 : i32
    %c0_i32_0 = arith.constant 0 : i32
    return %arg0, %c0_i32 : i32, i32
  }
  func.func @transform_1(%arg0: i32, %arg1: i32) -> (i32, i32) {
    %c0_i32 = arith.constant 0 : i32
    %c0_i32_0 = arith.constant 0 : i32
    return %c0_i32, %arg1 : i32, i32
  }
  func.func @transform_2(%arg0: i32, %arg1: i32) -> (i32, i32) {
    %c0_i32 = arith.constant 0 : i32
    %c0_i32_0 = arith.constant 0 : i32
    return %c0_i32, %arg1 : i32, i32
  }
  func.func @transform_3(%arg0: i32, %arg1: i32) -> (i32, i32) {
    %c0_i32 = arith.constant 0 : i32
    return %arg0, %arg1 : i32, i32
  }
}

</mosaic_0001>

<bundles_post_ra>
// kernel: sigmod_linear_padded.1
= control target key start
LH: loop header
LB: loop body
LE: loop exit
PB: predicated region body
PF: predicated region fallthrough
CT: control target
= control target key end

     0   :  { %8 = vsyncpa [#allocation3], 0  ;;  %s253_s12 = smov [#allocation2]   ;;  %s293_s0 = inlined_call_operand.vmem [shape: bf16[16,128], index: 0, kind: input, shape index: {}]   ;;  %s294_s1 = inlined_call_operand.hbm [shape: bf16[128,128], index: 1, kind: input, shape index: {}]   ;;  %s295_s2 = inlined_call_operand.vmem [shape: f32[1,128], index: 2, kind: input, shape index: {}]   ;;  %s296_s3 = inlined_call_operand.vmem [shape: f32[16,128], index: 3, kind: output, shape index: {}]  }
   0x1   :  { %s16_s13 = sshll.u32 %s253_s12, 4  ;;  %s17_s13 = int_to_ptr.vmem [resolvable:$true] %s16_s13 }
   0x2   :  { %s239_s14 = scalar_lea.vmem %s17_s13, 1024  ;;  %p244_p1 = scmp.lt.s32.totalorder %s17_s13, %s17_s13 }
   0x3   :  { %p240_p0 = scmp.ne.s32.totalorder %s17_s13, %s239_s14  ;;  %p245_p2 = scmp.lt.s32.totalorder %s239_s14, %s239_s14 }
   0x5   :  { %p246_p3 = por %p245_p2, %p244_p1 }
   0x7   :  { %p247_p4 = pnand %p246_p3, %p240_p0 }
   0x9   :  { %250 = shalt.err (!%p247_p4)
}
   0xa   :  { %s254_s15 = smov 64   ;;  %s255_s16 = smov 4  }
   0xb   :  { %22 = dma.hbm_to_vmem [thread:$0]  %s294_s1, 1024, %s17_s13, [#allocation3], %s254_s15, %s254_s15, %s255_s16  }
   0xc   :  { %251 = dma.done.wait [#allocation3], 1024  }
   0xd   :  { %252 = vsyncadd [#allocation3], 4294966272  ;;  %v256_v0 = vmov 0.0   ;;  %vm257_vm0 = vmmov 0   ;;  %v214_v1 = vld [vmem:[#allocation2 + $0x38] sm:$0xff]   ;;  %v215_v2 = vld [vmem:[#allocation2 + $0x30] sm:$0xff]  }
   0xe   :  { %189 = vmatprep.subr.bf16.mxu0 %v256_v0  ;;  %205 = vmatprep.mubr.msk.bf16.mxu0 %vm257_vm0, %v256_v0  ;;  %v216_v3 = vld [vmem:[#allocation2 + $0x28] sm:$0xff]   ;;  %v217_v4 = vld [vmem:[#allocation2 + $0x20] sm:$0xff]   ;;  %v218_v5 = vld [vmem:[#allocation2 + $0x18] sm:$0xff]  }
   0xf   :  { %190 = vmatpush3.bf16.msra.mxu0 %v214_v1  ;;  %v219_v6 = vld [vmem:[#allocation2 + $0x10] sm:$0xff]   ;;  %v220_v7 = vld [vmem:[#allocation2 + $0x8] sm:$0xff]   ;;  %v221_v8 = vld [vmem:[#allocation2] sm:$0xff]  }
  0x10   :  { %191 = vmatprep.subr.bf16.mxu0 %v256_v0  ;;  %v222_v9 = vld [vmem:[%s293_s0] sm:$0xff]  }
  0x11   :  { %v168_v10 = vld [vmem:[%s295_s2] ss:$0 sm:$0xff] }
  0x13   :  { %192 = vmatpush3.bf16.msra.mxu0 %v215_v2 }
  0x14   :  { %193 = vmatprep.subr.bf16.mxu0 %v256_v0 }
  0x17   :  { %194 = vmatpush3.bf16.msra.mxu0 %v216_v3 }
  0x18   :  { %195 = vmatprep.subr.bf16.mxu0 %v256_v0 }
  0x1b   :  { %196 = vmatpush3.bf16.msra.mxu0 %v217_v4 }
  0x1c   :  { %197 = vmatprep.subr.bf16.mxu0 %v256_v0 }
  0x1f   :  { %198 = vmatpush3.bf16.msra.mxu0 %v218_v5 }
  0x20   :  { %199 = vmatprep.subr.bf16.mxu0 %v256_v0 }
  0x23   :  { %200 = vmatpush3.bf16.msra.mxu0 %v219_v6 }
  0x24   :  { %201 = vmatprep.subr.bf16.mxu0 %v256_v0 }
  0x27   :  { %202 = vmatpush3.bf16.msra.mxu0 %v220_v7 }
  0x28   :  { %203 = vmatprep.subr.bf16.mxu0 %v256_v0 }
  0x2b   :  { %204 = vmatpush3.bf16.msra.mxu0 %v221_v8 }
  0x2e   :  { %206 = vmatmul.mubr.bf16.vlgmr.msra.gmra.mxu0 %v222_v9 }
  0xee   :  { %v142_v11 = vpop.f32.mrf.mxu0 }
  0xef   :  { %v143_v12 = vadd.f32 %v168_v10, %v142_v11 }
  0xf0   :  { %v207_v13 = vpop.f32.mrf.mxu0 }
  0xf1   :  { %v178_v14 = vmul.f32 -1.442695, %v143_v12 }
  0xf2   :  { %v145_v15 = vpop.f32.mrf.mxu0 }
  0xf3   :  { %223 = vpow2.f32 %v178_v14  ;;  %v146_v16 = vadd.f32 %v168_v10, %v145_v15 }
  0xf4   :  { %v208_v17 = vpop.f32.mrf.mxu0 }
  0xf5   :  { %v179_v18 = vmul.f32 -1.442695, %v146_v16 }
  0xf7   :  { %225 = vpow2.f32 %v179_v18 }
 0x100   :  { %v224_v19 = vpop.eup %223 }
 0x101   :  { %v155_v20 = vadd.f32 1.0, %v224_v19 }
 0x103   :  { %227 = vrcp.f32 %v155_v20 }
 0x104   :  { %v226_v21 = vpop.eup %225 }
 0x105   :  { %v156_v22 = vadd.f32 1.0, %v226_v21 }
 0x107   :  { %229 = vrcp.f32 %v156_v22 }
 0x110   :  { %v228_v23 = vpop.eup %227 }
 0x111   :  { %161 = vst [vmem:[%s296_s3] sm:$0xff] %v228_v23 }
 0x114   :  { %v230_v24 = vpop.eup %229 }
 0x115   :  { %162 = vst [vmem:[%s296_s3 + $0x8] sm:$0xff] %v230_v24 }
 0x116   :  { %167 = vsyncpa [#allocation3], 1 }

</bundles_post_ra>
